<compile_context>
chip_gen: v7x
topology: tpu7x:2x2x1
jax: 0.10.0
libtpu: 0.0.40
codegen_flags: <defaults>
</compile_context>

<pallas_src>
import jax
import jax.numpy as jnp
from jax import lax
from jax.experimental import pallas as pl
from jax.experimental.pallas import tpu as pltpu

# Python literals only (a jnp scalar captured by the kernel was the previous
# version's compile error: "kernel captures constants").
_BIG = 1e30                      # padded buffer rows can never win the argmin
_INT_MAX = 2 ** 31 - 1
_TARGET_TILE_BYTES = 1 << 20     # ~1 MiB of buffer rows streamed per grid step


def _round_up(x, m):
    return (x + m - 1) // m * m


# ---------------------------------------------------------------------------
# Kernels
# ---------------------------------------------------------------------------
def _shift_kernel(x_ref, o_ref, s_ref):
    # torch: (x > 0).float(); zeros -> -1   =>   x > 0 -> 1.0, else -> -1.0
    shifted = jnp.where(x_ref[...] > 0, 1.0, -1.0)
    o_ref[...] = shifted.astype(o_ref.dtype)   # returned training batch
    s_ref[...] = shifted.astype(s_ref.dtype)   # bf16 copy stored in the buffer


def _knn_kernel(x_ref, buf_ref, sq_ref, o_ref, min_ref, idx_ref):
    ni = pl.program_id(1)

    @pl.when(ni == 0)
    def _():
        min_ref[...] = jnp.full(min_ref.shape, float("inf"), jnp.float32)
        idx_ref[...] = jnp.zeros(idx_ref.shape, jnp.int32)

    x = x_ref[...]                               # [tb, Dp] queries (buf dtype)
    buf = buf_ref[...]                           # [tn, Dp] buffer tile

    # cross[b, n] = x[b] . buf[n]: contract last dims of both operands so no
    # transposed buffer tile is materialized (native MXU mapping).
    cross = lax.dot_general(x, buf, (((1,), (1,)), ((), ())),
                            preferred_element_type=jnp.float32)   # [tb, tn]

    # Rank by 0.5*||buf||^2 - x.buf  (== 0.5*(||x - buf||^2 - ||x||^2)).
    score = sq_ref[...] - cross                                   # [tb, tn]

    # Tile-local argmin with first-occurrence tie-breaking.
    local_min = jnp.min(score, axis=1, keepdims=True)             # [tb, 1]
    n_iota = lax.broadcasted_iota(jnp.int32, score.shape, 1)
    local_idx = jnp.min(
        jnp.where(score == local_min, n_iota, _INT_MAX),
        axis=1, keepdims=True)                                    # [tb, 1]
    global_idx = ni * buf_ref.shape[0] + local_idx                # [tb, 1]

    # Strict '<' keeps the earliest (lowest-index) winner across N tiles,
    # matching torch.topk / argmin first-occurrence semantics.
    take = local_min < min_ref[...]
    min_ref[...] = jnp.where(take, local_min, min_ref[...])
    idx_ref[...] = jnp.where(take, global_idx, idx_ref[...])

    @pl.when(ni == pl.num_programs(1) - 1)
    def _():
        o_ref[...] = idx_ref[...]


# ---------------------------------------------------------------------------
# Wrappers
# ---------------------------------------------------------------------------
def shift_inputs(x, store_dtype=jnp.bfloat16):
    """From sparse r[0,1] to b[-1,1]; also emits the storage copy (fused:
    one HBM read of the batch, no separate .astype pass)."""
    B, D = x.shape
    tb = B
    for cand in (512, 256, 128, 64, 32, 16, 8):
        if B % cand == 0:
            tb = cand
            break
    spec = pl.BlockSpec((tb, D), lambda i: (i, 0))
    return pl.pallas_call(
        _shift_kernel,
        out_shape=(jax.ShapeDtypeStruct((B, D), x.dtype),
                   jax.ShapeDtypeStruct((B, D), store_dtype)),
        grid=(B // tb,),
        in_specs=[spec],
        out_specs=(spec, spec),
        compiler_params=pltpu.CompilerParams(
            dimension_semantics=("parallel",)),
    )(x)


def _prepare_lookup_cache(buffer):
    """Built ONCE per buffer update (lazily at the first eval call after
    training), never in the per-lookup hot path:
      * buffer padded lane-dense to [Np, Dp] in its streaming dtype,
      * 0.5*||row||^2 (distance scaling folded in) as a lane-dense [1, Np]
        f32 row, padded rows pushed to a huge value so they never win,
      * the N tile size used to stream the buffer.
    """
    N, D = buffer.shape
    itemsize = buffer.dtype.itemsize
    Dp = _round_up(D, 128)
    # ~1 MiB of buffer rows per grid step so the lookup is HBM-bound rather
    # than per-grid-step-overhead-bound; capped so the [tb, tn] score tile and
    # double-buffered DMA stay comfortably inside VMEM on every generation.
    tn = _TARGET_TILE_BYTES // (Dp * itemsize)
    tn = _round_up(max(128, min(tn, 4096)), 128)
    Np = _round_up(N, 128)
    if tn >= Np:
        tn = Np                      # single streamed tile, minimal padding
    else:
        Np = _round_up(N, tn)
    buf_p = jnp.zeros((Np, Dp), buffer.dtype).at[:N, :D].set(buffer)
    sq = 0.5 * jnp.sum(buffer.astype(jnp.float32) ** 2, axis=1)
    sq_p = jnp.full((1, Np), _BIG, jnp.float32).at[0, :N].set(sq)
    return buf_p, sq_p, tn


def knn_lookup(inputs, buf_p, sq_p, tn):
    """For each query row, return the index of its nearest (L2) buffer row."""
    B, D = inputs.shape
    Np, Dp = buf_p.shape
    itemsize = buf_p.dtype.itemsize
    assert D <= Dp

    # Query tile: keep all (padded) query rows resident in a single tile when
    # the batch is small (the common recall case) so the stored buffer streams
    # from HBM exactly once; big batches fall back to multiple query tiles.
    tb = min(_round_up(B, 8), 256)
    tb = min(tb, max(8, ((2 << 20) // (Dp * itemsize)) // 8 * 8))
    Bp = _round_up(B, tb)
    nb, nn = Bp // tb, Np // tn

    # Pad features and cast to the buffer's streaming dtype once, here in the
    # wrapper, instead of re-casting the query tile on every N step in-kernel.
    x_p = jnp.zeros((Bp, Dp), buf_p.dtype).at[:B, :D].set(
        inputs.astype(buf_p.dtype))

    # VMEM budget from the actual tile footprint (v7x only has 64 MiB).
    vmem_need = (2 * tn * Dp * itemsize        # double-buffered buffer tile
                 + 2 * tb * Dp * itemsize      # double-buffered query tile
                 + 2 * tn * 4                  # double-buffered 0.5*||b||^2
                 + 4 * tb * 128 * 4            # idx output + scratch (lane pad)
                 + 6 * tb * tn * 4)            # score / iota / mask temporaries
    vmem_limit = int(min(max(32 * 1024 * 1024, 2 * vmem_need),
                         48 * 1024 * 1024))

    flops = 2 * Bp * Np * Dp                   # single cross matmul per pair
    bytes_accessed = (nb * Np * (Dp * itemsize + 4)   # streamed buffer + norms
                      + Bp * Dp * itemsize            # queries
                      + Bp * 4)                       # index output

    idx_p = pl.pallas_call(
        _knn_kernel,
        out_shape=jax.ShapeDtypeStruct((Bp, 1), jnp.int32),
        grid=(nb, nn),                         # N (reduction) axis innermost
        in_specs=[
            pl.BlockSpec((tb, Dp), lambda bi, ni: (bi, 0)),   # queries
            pl.BlockSpec((tn, Dp), lambda bi, ni: (ni, 0)),   # buffer tile
            pl.BlockSpec((1, tn), lambda bi, ni: (0, ni)),    # 0.5*||b||^2
        ],
        out_specs=pl.BlockSpec((tb, 1), lambda bi, ni: (bi, 0)),
        scratch_shapes=[
            pltpu.VMEM((tb, 1), jnp.float32),   # running best (half) distance
            pltpu.VMEM((tb, 1), jnp.int32),     # running best row index
        ],
        compiler_params=pltpu.CompilerParams(
            # TODO(synk): on v7x (2 TensorCores) a small-batch lookup has only
            # one step on the parallel axis; splitting N across cores (with a
            # small cross-core combine) would keep both cores busy.
            dimension_semantics=("parallel", "arbitrary"),
            vmem_limit_bytes=vmem_limit),
        cost_estimate=pl.CostEstimate(flops=int(flops), transcendentals=0,
                                      bytes_accessed=int(bytes_accessed)),
    )(x_p, buf_p, sq_p)
    return idx_p[:B, 0]


# ---------------------------------------------------------------------------
# Module
# ---------------------------------------------------------------------------
class KNNBuffer:
    """JAX/Pallas port of cls_module KNNBuffer (forward semantics)."""

    def __init__(self, input_shape, target_shape, config):
        self.config = config
        self.training = True
        self.reset()

    def set_buffer_mode(self, mode='override'):
        self.buffer_mode = mode

    def reset(self):
        self.buffer = None
        self.buffer_batch = None
        self.buffer_mode = 'override'
        self._buf_p = None
        self._sq_p = None
        self._tn = None
        self._cache_dirty = True

    def train(self):
        self.training = True

    def eval(self):
        self.training = False

    def __call__(self, inputs):
        if self.training:
            if self.config['shift_range']:
                # Fused shift (+-1) + bf16 storage copy: one pass over the
                # batch.  +-1 is exact in bf16 and bf16 streaming halves HBM
                # bytes for the mem-bound lookup.
                inputs, stored = shift_inputs(inputs)
            else:
                # TODO(synk): arbitrary float patterns are kept in their native
                # dtype (bf16 would lose precision for non +-1 values).
                stored = inputs
            self.buffer_batch = inputs
            if self.buffer is None or self.buffer_mode == 'override':
                self.buffer = stored
            elif self.buffer_mode == 'append':
                self.buffer = jnp.concatenate((self.buffer, stored), axis=0)
            self._cache_dirty = True   # padded buffer rebuilt lazily at eval
            return self.buffer_batch

        # Test time: K=1 nearest-neighbour recall from the stored buffer.
        # Padding / bf16 conversion / folded norms happen once per buffer
        # update, not on every lookup.
        if self._cache_dirty or self._buf_p is None:
            self._buf_p, self._sq_p, self._tn = _prepare_lookup_cache(self.buffer)
            self._cache_dirty = False
        idx = knn_lookup(inputs, self._buf_p, self._sq_p, self._tn)
        # Tiny gather of the winning rows from the (unpadded) stored buffer.
        return jnp.take(self.buffer, idx, axis=0).astype(inputs.dtype)


# ---------------------------------------------------------------------------
# Main
# ---------------------------------------------------------------------------
if __name__ == "__main__":
    key = jax.random.PRNGKey(0)
    config = {'shift_range': True}
    k1, k2, k3, k4 = jax.random.split(key, 4)

    # ---- case 1: single training batch, override mode ----------------------
    B, D = 8, 32
    module = KNNBuffer(input_shape=(B, D), target_shape=(B, D), config=config)

    train_patterns = (jax.random.uniform(k1, (B, D), dtype=jnp.float32) > 0.7
                      ).astype(jnp.float32)          # sparse {0,1} patterns
    module.train()
    stored = jax.block_until_ready(module(train_patterns))

    test_inputs = stored + 0.2 * jax.random.normal(k2, (B, D), dtype=jnp.float32)
    module.eval()
    recalled = jax.block_until_ready(module(test_inputs))

    buf = module.buffer.astype(jnp.float32)
    d = jnp.linalg.norm(buf[None, :, :] - test_inputs[:, None, :], axis=2)
    ref = buf[jnp.argmin(d, axis=1)]
    assert recalled.shape == test_inputs.shape
    assert recalled.dtype == test_inputs.dtype
    assert jnp.allclose(recalled, ref, atol=1e-5), "case 1: mismatch vs reference"

    # ---- case 2: append mode, buffer spans several hundred rows -------------
    module2 = KNNBuffer(input_shape=(128, D), target_shape=(128, D), config=config)
    module2.set_buffer_mode('append')
    module2.train()
    for step in range(5):                            # buffer grows to 640 rows
        kk = jax.random.fold_in(k3, step)
        batch = (jax.random.uniform(kk, (128, D), dtype=jnp.float32) > 0.7
                 ).astype(jnp.float32)
        module2(batch)

    module2.eval()
    buf2 = module2.buffer.astype(jnp.float32)
    q_idx = jnp.arange(0, buf2.shape[0], 40)         # 16 queries across buffer
    queries = buf2[q_idx] + 0.15 * jax.random.normal(
        k4, (q_idx.shape[0], D), dtype=jnp.float32)
    recalled2 = jax.block_until_ready(module2(queries))

    d2r = jnp.linalg.norm(buf2[None, :, :] - queries[:, None, :], axis=2)
    ref2 = buf2[jnp.argmin(d2r, axis=1)]
    assert jnp.allclose(recalled2, ref2, atol=1e-5), "case 2: mismatch vs reference"

    print("KERNEL_OK")
</pallas_src>

<mosaic_0001>
module attributes {stable_mosaic.version = 11 : i64} {
  func.func @_shift_kernel(%arg0: i32, %arg1: memref<8x32xf32, #tpu.memory_space<vmem>>, %arg2: memref<8x32xf32, #tpu.memory_space<vmem>>, %arg3: memref<8x32xbf16, #tpu.memory_space<vmem>>) attributes {dimension_semantics = [#tpu.dimension_semantics<parallel>], iteration_bounds = array<i64: 1>, scalar_prefetch = 0 : i64, scratch_operands = 0 : i64, tpu.core_type = #tpu.core_type<tc>, window_params = [{transform_indices = @transform_0, window_bounds = array<i64: 8, 32>}, {transform_indices = @transform_1, window_bounds = array<i64: 8, 32>}, {transform_indices = @transform_2, window_bounds = array<i64: 8, 32>}]} {
    %c0 = arith.constant 0 : index
    %c0_0 = arith.constant 0 : index
    %0 = vector.load %arg1[%c0, %c0_0] : memref<8x32xf32, #tpu.memory_space<vmem>>, vector<8x32xf32>
    %cst = arith.constant 0.000000e+00 : f32
    %1 = vector.broadcast %cst : f32 to vector<8x32xf32>
    %2 = arith.cmpf ogt, %0, %1 : vector<8x32xf32>
    %cst_1 = arith.constant 1.000000e+00 : f32
    %cst_2 = arith.constant -1.000000e+00 : f32
    %3 = vector.broadcast %cst_1 : f32 to vector<8x32xf32>
    %4 = vector.broadcast %cst_2 : f32 to vector<8x32xf32>
    %5 = arith.select %2, %3, %4 : vector<8x32xi1>, vector<8x32xf32>
    %c0_3 = arith.constant 0 : index
    %c0_4 = arith.constant 0 : index
    %6 = vector.load %arg2[%c0_3, %c0_4] : memref<8x32xf32, #tpu.memory_space<vmem>>, vector<8x32xf32>
    tpu.vector_store %arg2[%c0_3, %c0_4], %5 {strides = array<i32>} : memref<8x32xf32, #tpu.memory_space<vmem>>, vector<8x32xf32>,
    %7 = arith.truncf %5 : vector<8x32xf32> to vector<8x32xbf16>
    %c0_5 = arith.constant 0 : index
    %c0_6 = arith.constant 0 : index
    %8 = vector.load %arg3[%c0_5, %c0_6] : memref<8x32xbf16, #tpu.memory_space<vmem>>, vector<8x32xbf16>
    tpu.vector_store %arg3[%c0_5, %c0_6], %7 {strides = array<i32>} : memref<8x32xbf16, #tpu.memory_space<vmem>>, vector<8x32xbf16>,
    return
  }
  func.func @transform_0(%arg0: i32) -> (i32, i32) {
    %c0_i32 = arith.constant 0 : i32
    %c0_i32_0 = arith.constant 0 : i32
    return %arg0, %c0_i32 : i32, i32
  }
  func.func @transform_1(%arg0: i32) -> (i32, i32) {
    %c0_i32 = arith.constant 0 : i32
    %c0_i32_0 = arith.constant 0 : i32
    return %arg0, %c0_i32 : i32, i32
  }
  func.func @transform_2(%arg0: i32) -> (i32, i32) {
    %c0_i32 = arith.constant 0 : i32
    %c0_i32_0 = arith.constant 0 : i32
    return %arg0, %c0_i32 : i32, i32
  }
}

</mosaic_0001>

<bundles_post_ra>
// kernel: tpu_custom_call.1
= control target key start
LH: loop header
LB: loop body
LE: loop exit
PB: predicated region body
PF: predicated region fallthrough
CT: control target
= control target key end

     0   :  { %8 = vsyncpa [#allocation3], 0  ;;  %s193_s0 = inlined_call_operand.hbm [shape: f32[8,32], index: 0, kind: input, shape index: {}]   ;;  %s194_s1 = inlined_call_operand.hbm [shape: f32[8,32], index: 1, kind: output, shape index: {0}]   ;;  %s195_s2 = inlined_call_operand.hbm [shape: bf16[8,32], index: 2, kind: output, shape index: {1}]  }
   0x1   :  { %9 = vsyncpa [#allocation4], 0 }
   0x2   :  { %10 = vsyncpa [#allocation7], 0  ;;  %s137_s9 = smov [#allocation2]   ;;  %s65_s13 = scalar_lea.hbm %s193_s0, 128 }
   0x3   :  { %s17_s10 = sshll.u32 %s137_s9, 4  ;;  %p66_p0 = scmp.ne.s32.totalorder %s193_s0, %s65_s13  ;;  %s18_s10 = int_to_ptr.vmem [resolvable:$true] %s17_s10 }
   0x4   :  { %p69_p1 = scmp.lt.u32.totalorder %s65_s13, %s193_s0 }
   0x6   :  { %p71_p2 = pnand %p69_p1, %p66_p0 }
   0x8   :  { %74 = shalt.err (!%p71_p2)
}
   0x9   :  { %s75_s18 = scalar_lea.vmem %s18_s10, 128  ;;  %p80_p4 = scmp.lt.s32.totalorder %s18_s10, %s18_s10 }
   0xa   :  { %p76_p3 = scmp.ne.s32.totalorder %s18_s10, %s75_s18  ;;  %p81_p5 = scmp.lt.s32.totalorder %s75_s18, %s75_s18 }
   0xc   :  { %p82_p6 = por %p81_p5, %p80_p4 }
   0xe   :  { %p83_p7 = pnand %p82_p6, %p76_p3 }
  0x10   :  { %86 = shalt.err (!%p83_p7)
}
  0x11   :  { %20 = dma.hbm_to_vmem [thread:$0]  %s193_s0, 128, %s18_s10, [#allocation3]  }
  0x12   :  { %131 = dma.done.wait [#allocation3], 128  }
  0x13   :  { %132 = vsyncadd [#allocation3], 4294967168  ;;  %s138_s21 = smov [#allocation5]   ;;  %v24_v0 = vld [vmem:[#allocation2] sm:$0xff]  ;;  %vm27_vm0 = vcmask 261120   ;;  %s139_s23 = smov [#allocation6]  }
  0x14   :  { %s38_s22 = sshll.u32 %s138_s21, 4  ;;  %s48_s24 = sshll.u32 %s139_s23, 4  ;;  %vm25_vm1 = vcmp.gt.f32.partialorder %v24_v0, 0.0  ;;  %v140_v1 = vmov -1.0   ;;  %vm30_vm2 = vcmask 257024   ;;  %s39_s22 = int_to_ptr.vmem [resolvable:$true] %s38_s22  ;;  %s49_s24 = int_to_ptr.vmem [resolvable:$true] %s48_s24 }
  0x15   :  { %v26_v2 = vsel %vm25_vm1, 1.0, %v140_v1  ;;  %s87_s25 = scalar_lea.vmem %s39_s22, 128  ;;  %p92_p9 = scmp.lt.s32.totalorder %s39_s22, %s39_s22 }
  0x16   :  { %28 = vst.msk [vmem:[#allocation5] sm:$0xff] %vm27_vm0, %v26_v2  ;;  %v29_v3 = vpack.c.bf16 %v26_v2, %v26_v2  ;;  %p88_p8 = scmp.ne.s32.totalorder %s39_s22, %s87_s25  ;;  %p93_p10 = scmp.lt.s32.totalorder %s87_s25, %s87_s25 }
  0x18   :  { %p94_p11 = por %p93_p10, %p92_p9 }
  0x1a   :  { %p95_p12 = pnand %p94_p11, %p88_p8 }
  0x1c   :  { %98 = shalt.err (!%p95_p12)
}
  0x1d   :  { %s99_s27 = scalar_lea.hbm %s194_s1, 128 }
  0x1e   :  { %p100_p13 = scmp.ne.s32.totalorder %s194_s1, %s99_s27  ;;  %p103_p0 = scmp.lt.u32.totalorder %s99_s27, %s194_s1 }
  0x20   :  { %p105_p1 = pnand %p103_p0, %p100_p13 }
  0x22   :  { %108 = shalt.err (!%p105_p1)
}
  0x23   :  { %41 = dma.vmem_to_hbm [thread:$0]  %s39_s22, 128, %s194_s1, [#allocation4]   ;;  %31 = vst.msk [vmem:[#allocation6] sm:$0xf] %vm30_vm2, %v29_v3 }
  0x24   :  { %s109_s6 = scalar_lea.vmem %s49_s24, 64  ;;  %p114_p3 = scmp.lt.s32.totalorder %s49_s24, %s49_s24 }
  0x25   :  { %p110_p2 = scmp.ne.s32.totalorder %s49_s24, %s109_s6  ;;  %p115_p4 = scmp.lt.s32.totalorder %s109_s6, %s109_s6 }
  0x27   :  { %p116_p5 = por %p115_p4, %p114_p3 }
  0x29   :  { %p117_p6 = pnand %p116_p5, %p110_p2 }
  0x2b   :  { %120 = shalt.err (!%p117_p6)
}
  0x2c   :  { %s121_s9 = scalar_lea.hbm %s195_s2, 64 }
  0x2d   :  { %p122_p7 = scmp.ne.s32.totalorder %s195_s2, %s121_s9  ;;  %p125_p8 = scmp.lt.u32.totalorder %s121_s9, %s195_s2 }
  0x2f   :  { %p127_p9 = pnand %p125_p8, %p122_p7 }
  0x31   :  { %130 = shalt.err (!%p127_p9)
}
  0x32   :  { %51 = dma.vmem_to_hbm [thread:$0]  %s49_s24, 64, %s195_s2, [#allocation7]  }
  0x33   :  { %133 = dma.done.wait [#allocation4], 128  }
  0x34   :  { %134 = vsyncadd [#allocation4], 4294967168 }
  0x35   :  { %135 = dma.done.wait [#allocation7], 64  }
  0x36   :  { %136 = vsyncadd [#allocation7], 4294967232 }
  0x37   :  { %58 = vsyncpa [#allocation3], 1 }
  0x38   :  { %59 = vsyncpa [#allocation4], 1 }
  0x39   :  { %60 = vsyncpa [#allocation7], 1 }

</bundles_post_ra>
